<compile_context>
chip_gen: v6e
topology: v6e:2x2x1
jax: 0.10.0
libtpu: 0.0.40
codegen_flags: <defaults>
</compile_context>

<pallas_src>
import jax
import jax.numpy as jnp
import numpy as np
from jax.experimental import pallas as pl
from jax.experimental.pallas import tpu as pltpu

# ---------------- model config (mirrors CNNClassifier.__init__ args) ----------------
NUM_WORDS = 20
EMBEDDING_SIZE = 16      # E
INPUT_CHANNEL = 2        # C
OUTPUT_CHANNEL = 8       # O
FILTER_HEIGHTS = (2, 3)
MAX_SENTENCE_LEN = 8     # L
NUM_CLASSES = 4
BATCH = 2

E = EMBEDDING_SIZE
O = OUTPUT_CHANNEL
L = MAX_SENTENCE_LEN
NC = NUM_CLASSES
V1 = NUM_WORDS + 1                      # vocab rows (incl. padding idx 0)
NF = len(FILTER_HEIGHTS)
H = O * NF                              # pooled feature width (16)
MAXFH = max(FILTER_HEIGHTS)
CE = INPUT_CHANNEL * E                  # conv reduction dim (c, e) = 32

LANE = 128


def _ceil_to(x, m):
    return ((x + m - 1) // m) * m


VP = _ceil_to(V1, LANE)                 # 128  one-hot width / embedding rows
CEP = _ceil_to(CE, LANE)                # 128  padded (c, e) reduction dim
HP = _ceil_to(H, LANE)                  # 128  padded filter-bank / hidden / output width
BT = 8                                  # batch tile (f32 sublane height)
BTL = BT * L                            # flattened (batch, time) rows per tile

# ---- parameter-slab row layout (single (R_TOTAL, 128) f32 slab) ----
EMB_R0 = 0                              # rows [0, 128): concatenated embedding tables
BIAS_R0 = EMB_R0 + VP                   # rows [128, 136): bias block (8 rows)
CB_ROW, B1_ROW, B2_ROW = 0, 1, 2        # conv bias / linear1 bias / linear2 bias
W1_R0 = BIAS_R0 + 8                     # rows [136, 264): linear1 weight (in, out)
W2_R0 = W1_R0 + HP                      # rows [264, 392): linear2 weight (in, out)
R_TOTAL = W2_R0 + HP                    # 392


# ------------------------------- Pallas kernel --------------------------------------
def _fused_kernel(tok_ref, wconv_ref, params_ref, out_ref):
    f32 = jnp.float32

    # ---- 1) embedding lookup (all channels at once) as a one-hot MXU matmul ----
    tok = tok_ref[...]                                                   # (BTL, 1) int32
    vocab_iota = jax.lax.broadcasted_iota(jnp.int32, (BTL, VP), 1)
    onehot = (vocab_iota == tok).astype(f32)                             # (BTL, VP)
    emb_cat = params_ref[EMB_R0:EMB_R0 + VP, :]                          # (VP, CEP)
    emb_flat = jnp.dot(onehot, emb_cat, preferred_element_type=f32)      # (BTL, CEP)

    # ---- 2) conv (both filter heights) as ONE wide 2-D matmul over (c, e),
    #          summed over static time shifts dh (fused im2col) ----
    z = jnp.dot(emb_flat, wconv_ref[...], preferred_element_type=f32)    # (BTL, MAXFH*HP)
    conv = z[:, 0:HP]
    for dh in range(1, MAXFH):
        zd = z[:, dh * HP:(dh + 1) * HP]
        # shift rows up by dh (rows that run past the tile are invalid & masked below)
        shifted = jnp.concatenate([zd[dh:, :], jnp.zeros((dh, HP), f32)], axis=0)
        conv = conv + shifted

    bias_blk = params_ref[BIAS_R0:BIAS_R0 + 8, :]                        # (8, HP)
    conv = jnp.maximum(conv + bias_blk[CB_ROW:CB_ROW + 1, :], 0.0)       # conv bias + ReLU

    # ---- 3) per-filter valid-length mask + max-pool over time ----
    # Exact: ReLU output is >= 0, so zeroing out-of-range time positions never
    # changes the max-pool result.
    conv3 = conv.reshape(BT, L, HP)
    t3 = jax.lax.broadcasted_iota(jnp.int32, (BT, L, HP), 1)
    c3 = jax.lax.broadcasted_iota(jnp.int32, (BT, L, HP), 2)
    thr3 = jnp.full((BT, L, HP), -1, jnp.int32)
    for i, fh in enumerate(FILTER_HEIGHTS):
        in_blk = (c3 >= i * O) & (c3 < (i + 1) * O)
        thr3 = jnp.where(in_blk, L - fh, thr3)
    conv3 = jnp.where(t3 <= thr3, conv3, 0.0)
    pooled = jnp.max(conv3, axis=1)                                      # (BT, HP)

    # ---- 4) linear1 + tanh  (dropout(p=0.5, training=False) is the identity) ----
    w1 = params_ref[W1_R0:W1_R0 + HP, :]
    h1 = jnp.tanh(jnp.dot(pooled, w1, preferred_element_type=f32)
                  + bias_blk[B1_ROW:B1_ROW + 1, :])

    # ---- 5) linear2, lane-dense store (cols >= NUM_CLASSES are zero) ----
    w2 = params_ref[W2_R0:W2_R0 + HP, :]
    out_ref[...] = (jnp.dot(h1, w2, preferred_element_type=f32)
                    + bias_blk[B2_ROW:B2_ROW + 1, :])


def _fused_forward(tok_col, w_conv, slab, n_bt):
    return pl.pallas_call(
        _fused_kernel,
        out_shape=jax.ShapeDtypeStruct((n_bt * BT, LANE), jnp.float32),
        grid=(n_bt,),
        in_specs=[
            pl.BlockSpec((BTL, 1), lambda b: (b, 0)),              # token ids, per batch tile
            pl.BlockSpec((CEP, MAXFH * HP), lambda b: (0, 0)),     # conv weight (resident)
            pl.BlockSpec((R_TOTAL, LANE), lambda b: (0, 0)),       # param slab (resident)
        ],
        out_specs=pl.BlockSpec((BT, LANE), lambda b: (b, 0)),
        compiler_params=pltpu.CompilerParams(
            dimension_semantics=("parallel",)),
    )(tok_col, w_conv, slab)


# ------------------------------- host-side packing -----------------------------------
def pack_params(params):
    """One-time packing of parameters into two lane-dense f32 slabs (zero-padded)."""
    emb, conv_ws, conv_bs, w1, b1, w2, b2 = params
    f32 = jnp.float32

    # concatenated embedding tables: rows = vocab, cols = (channel, embedding)
    emb_cat = jnp.zeros((VP, CEP), f32)
    for c in range(INPUT_CHANNEL):
        emb_cat = emb_cat.at[:V1, c * E:(c + 1) * E].set(emb[c])

    # conv weight: for each time-shift dh, a (CE, O) block per filter; padded rows/cols zero
    w_conv = jnp.zeros((CEP, MAXFH * HP), f32)
    for i, fh in enumerate(FILTER_HEIGHTS):
        w = conv_ws[i]                                            # (O, C, fh, E)
        for dh in range(fh):
            wd = jnp.transpose(w[:, :, dh, :], (1, 2, 0)).reshape(CE, O)   # (c,e) rows, o cols
            w_conv = w_conv.at[:CE, dh * HP + i * O: dh * HP + (i + 1) * O].set(wd)

    slab = jnp.zeros((R_TOTAL, LANE), f32)
    slab = slab.at[EMB_R0:EMB_R0 + VP, :].set(emb_cat)
    for i in range(NF):
        slab = slab.at[BIAS_R0 + CB_ROW, i * O:(i + 1) * O].set(conv_bs[i])
    slab = slab.at[BIAS_R0 + B1_ROW, :H].set(b1)
    slab = slab.at[BIAS_R0 + B2_ROW, :NC].set(b2)
    slab = slab.at[W1_R0:W1_R0 + H, :H].set(w1)
    slab = slab.at[W2_R0:W2_R0 + H, :NC].set(w2)
    return w_conv, slab


@jax.jit
def cnn_classifier_forward(token_ids, w_conv, slab):
    """Full forward: only token padding/flattening happens outside the Pallas kernel."""
    B = token_ids.shape[0]
    n_bt = (B + BT - 1) // BT
    tok_p = jnp.zeros((n_bt * BT, L), jnp.int32).at[:B].set(token_ids.astype(jnp.int32))
    tok_col = tok_p.reshape(n_bt * BT * L, 1)
    out_p = _fused_forward(tok_col, w_conv, slab, n_bt)
    return out_p[:B, :NC]


# ------------------------------- reference & init ------------------------------------
def reference_forward(token_ids, params):
    """Pure-JAX reference, mirroring the PyTorch forward exactly (eval path)."""
    emb, conv_ws, conv_bs, w1, b1, w2, b2 = params
    embedded = jnp.stack([emb[c][token_ids] for c in range(INPUT_CHANNEL)], axis=1)  # (B,C,L,E)
    pools = []
    for i, fh in enumerate(FILTER_HEIGHTS):
        conv = jax.lax.conv_general_dilated(
            embedded, conv_ws[i], window_strides=(1, 1), padding='VALID',
            dimension_numbers=('NCHW', 'OIHW', 'NCHW'))
        conv = conv + conv_bs[i].reshape(1, -1, 1, 1)
        conv = jnp.maximum(conv, 0.0)
        pools.append(jnp.max(conv, axis=(2, 3)))
    h = jnp.concatenate(pools, axis=1)
    h1 = jnp.tanh(h @ w1 + b1)      # dropout(p=0.5, training=False) == identity
    return h1 @ w2 + b2


def init_params(key):
    ks = jax.random.split(key, 10)
    # embeddings: (C, num_words+1, E), row 0 zeroed (padding_idx=0)
    emb = 0.1 * jax.random.normal(ks[0], (INPUT_CHANNEL, V1, E), jnp.float32)
    emb = emb.at[:, 0, :].set(0.0)
    conv_ws, conv_bs = [], []
    for i, fh in enumerate(FILTER_HEIGHTS):
        conv_ws.append(0.1 * jax.random.normal(
            ks[1 + 2 * i], (O, INPUT_CHANNEL, fh, E), jnp.float32))
        conv_bs.append(0.1 * jax.random.normal(ks[2 + 2 * i], (O,), jnp.float32))
    # linear weights stored in (in, out) convention
    w1 = 0.1 * jax.random.normal(ks[6], (H, H), jnp.float32)
    b1 = 0.1 * jax.random.normal(ks[7], (H,), jnp.float32)
    w2 = 0.1 * jax.random.normal(ks[8], (H, NC), jnp.float32)
    b2 = 0.1 * jax.random.normal(ks[9], (NC,), jnp.float32)
    return emb, conv_ws, conv_bs, w1, b1, w2, b2


if __name__ == "__main__":
    key = jax.random.PRNGKey(0)
    pkey, dkey = jax.random.split(key)
    params = init_params(pkey)
    token_ids = jax.random.randint(dkey, (BATCH, MAX_SENTENCE_LEN), 0, V1, dtype=jnp.int32)

    w_conv, slab = pack_params(params)          # one-time parameter packing
    out = cnn_classifier_forward(token_ids, w_conv, slab)
    out = jax.block_until_ready(out)

    ref = jax.block_until_ready(reference_forward(token_ids, params))
    assert out.shape == (BATCH, NUM_CLASSES), out.shape
    np.testing.assert_allclose(np.asarray(out), np.asarray(ref), rtol=1e-2, atol=1e-2)

    print("KERNEL_OK")
</pallas_src>

<mosaic_0001>
module attributes {stable_mosaic.version = 11 : i64} {
  func.func @_fused_kernel(%arg0: i32, %arg1: memref<64x1xi32, #tpu.memory_space<vmem>>, %arg2: memref<128x384xf32, #tpu.memory_space<vmem>>, %arg3: memref<392x128xf32, #tpu.memory_space<vmem>>, %arg4: memref<8x128xf32, #tpu.memory_space<vmem>>) attributes {dimension_semantics = [#tpu.dimension_semantics<parallel>], iteration_bounds = array<i64: 1>, scalar_prefetch = 0 : i64, scratch_operands = 0 : i64, tpu.core_type = #tpu.core_type<tc>, window_params = [{transform_indices = @transform_0, window_bounds = array<i64: 64, 1>}, {pipeline_mode = #tpu.pipeline_mode<synchronous>, transform_indices = @transform_1, window_bounds = array<i64: 128, 384>}, {pipeline_mode = #tpu.pipeline_mode<synchronous>, transform_indices = @transform_2, window_bounds = array<i64: 392, 128>}, {transform_indices = @transform_3, window_bounds = array<i64: 8, 128>}]} {
    %c0 = arith.constant 0 : index
    %c0_0 = arith.constant 0 : index
    %0 = vector.load %arg1[%c0, %c0_0] : memref<64x1xi32, #tpu.memory_space<vmem>>, vector<64x1xi32>
    %1 = tpu.iota {dimensions = array<i32: 1>} : vector<64x128xi32>
    %2 = vector.broadcast %0 : vector<64x1xi32> to vector<64x128xi32>
    %3 = arith.cmpi eq, %1, %2 : vector<64x128xi32>
    %4 = arith.extui %3 : vector<64x128xi1> to vector<64x128xi32>
    %5 = arith.sitofp %4 : vector<64x128xi32> to vector<64x128xf32>
    %c0_1 = arith.constant 0 : index
    %c0_2 = arith.constant 0 : index
    %6 = vector.load %arg3[%c0_1, %c0_2] : memref<392x128xf32, #tpu.memory_space<vmem>>, vector<128x128xf32>
    %cst = arith.constant dense<0.000000e+00> : vector<64x128xf32>
    %7 = tpu.matmul %5, %6, %cst {dimension_numbers = #tpu.dot_dimension_numbers<[1], [0], [0], [1], [0, 0, 1, 1], [], []>} : vector<64x128xf32>, vector<128x128xf32>, vector<64x128xf32> -> vector<64x128xf32>
    %c0_3 = arith.constant 0 : index
    %c0_4 = arith.constant 0 : index
    %8 = vector.load %arg2[%c0_3, %c0_4] : memref<128x384xf32, #tpu.memory_space<vmem>>, vector<128x384xf32>
    %cst_5 = arith.constant dense<0.000000e+00> : vector<64x384xf32>
    %9 = tpu.matmul %7, %8, %cst_5 {dimension_numbers = #tpu.dot_dimension_numbers<[1], [0], [0], [1], [0, 0, 1, 1], [], []>} : vector<64x128xf32>, vector<128x384xf32>, vector<64x384xf32> -> vector<64x384xf32>
    %10 = vector.extract_strided_slice %9 {offsets = [0, 0], sizes = [64, 128], strides = [1, 1]} : vector<64x384xf32> to vector<64x128xf32>
    %11 = vector.extract_strided_slice %9 {offsets = [0, 128], sizes = [64, 128], strides = [1, 1]} : vector<64x384xf32> to vector<64x128xf32>
    %12 = vector.extract_strided_slice %11 {offsets = [1, 0], sizes = [63, 128], strides = [1, 1]} : vector<64x128xf32> to vector<63x128xf32>
    %cst_6 = arith.constant 0.000000e+00 : f32
    %13 = vector.broadcast %cst_6 : f32 to vector<1x128xf32>
    %14 = tpu.concatenate %12, %13 in 0 : vector<63x128xf32>, vector<1x128xf32> -> vector<64x128xf32>
    %15 = arith.addf %10, %14 : vector<64x128xf32>
    %16 = vector.extract_strided_slice %9 {offsets = [0, 256], sizes = [64, 128], strides = [1, 1]} : vector<64x384xf32> to vector<64x128xf32>
    %17 = vector.extract_strided_slice %16 {offsets = [2, 0], sizes = [62, 128], strides = [1, 1]} : vector<64x128xf32> to vector<62x128xf32>
    %cst_7 = arith.constant 0.000000e+00 : f32
    %18 = vector.broadcast %cst_7 : f32 to vector<2x128xf32>
    %19 = tpu.concatenate %17, %18 in 0 : vector<62x128xf32>, vector<2x128xf32> -> vector<64x128xf32>
    %20 = arith.addf %15, %19 : vector<64x128xf32>
    %c128 = arith.constant 128 : index
    %c0_8 = arith.constant 0 : index
    %21 = vector.load %arg3[%c128, %c0_8] : memref<392x128xf32, #tpu.memory_space<vmem>>, vector<8x128xf32>
    %22 = vector.extract_strided_slice %21 {offsets = [0, 0], sizes = [1, 128], strides = [1, 1]} : vector<8x128xf32> to vector<1x128xf32>
    %23 = vector.broadcast %22 : vector<1x128xf32> to vector<64x128xf32>
    %24 = arith.addf %20, %23 : vector<64x128xf32>
    %cst_9 = arith.constant 0.000000e+00 : f32
    %25 = vector.broadcast %cst_9 : f32 to vector<64x128xf32>
    %26 = arith.maximumf %24, %25 : vector<64x128xf32>
    %27 = vector.shape_cast %26 : vector<64x128xf32> to vector<8x8x128xf32>
    %28 = tpu.iota {dimensions = array<i32: 1>} : vector<8x8x128xi32>
    %29 = tpu.iota {dimensions = array<i32: 2>} : vector<8x8x128xi32>
    %c-1_i32 = arith.constant -1 : i32
    %30 = vector.broadcast %c-1_i32 : i32 to vector<8x8x128xi32>
    %c0_i32 = arith.constant 0 : i32
    %31 = vector.broadcast %c0_i32 : i32 to vector<8x8x128xi32>
    %32 = arith.cmpi sge, %29, %31 : vector<8x8x128xi32>
    %c8_i32 = arith.constant 8 : i32
    %33 = vector.broadcast %c8_i32 : i32 to vector<8x8x128xi32>
    %34 = arith.cmpi slt, %29, %33 : vector<8x8x128xi32>
    %35 = arith.andi %32, %34 : vector<8x8x128xi1>
    %c6_i32 = arith.constant 6 : i32
    %36 = vector.broadcast %c6_i32 : i32 to vector<8x8x128xi32>
    %37 = arith.select %35, %36, %30 : vector<8x8x128xi1>, vector<8x8x128xi32>
    %c8_i32_10 = arith.constant 8 : i32
    %38 = vector.broadcast %c8_i32_10 : i32 to vector<8x8x128xi32>
    %39 = arith.cmpi sge, %29, %38 : vector<8x8x128xi32>
    %c16_i32 = arith.constant 16 : i32
    %40 = vector.broadcast %c16_i32 : i32 to vector<8x8x128xi32>
    %41 = arith.cmpi slt, %29, %40 : vector<8x8x128xi32>
    %42 = arith.andi %39, %41 : vector<8x8x128xi1>
    %c5_i32 = arith.constant 5 : i32
    %43 = vector.broadcast %c5_i32 : i32 to vector<8x8x128xi32>
    %44 = arith.select %42, %43, %37 : vector<8x8x128xi1>, vector<8x8x128xi32>
    %45 = arith.cmpi sle, %28, %44 : vector<8x8x128xi32>
    %cst_11 = arith.constant 0.000000e+00 : f32
    %46 = vector.broadcast %cst_11 : f32 to vector<8x8x128xf32>
    %47 = arith.select %45, %27, %46 : vector<8x8x128xi1>, vector<8x8x128xf32>
    %cst_12 = arith.constant dense<0xFF800000> : vector<8x128xf32>
    %48 = vector.multi_reduction <maximumf>, %47, %cst_12 [1] : vector<8x8x128xf32> to vector<8x128xf32>
    %c136 = arith.constant 136 : index
    %c0_13 = arith.constant 0 : index
    %49 = vector.load %arg3[%c136, %c0_13] : memref<392x128xf32, #tpu.memory_space<vmem>>, vector<128x128xf32>
    %cst_14 = arith.constant dense<0.000000e+00> : vector<8x128xf32>
    %50 = tpu.matmul %48, %49, %cst_14 {dimension_numbers = #tpu.dot_dimension_numbers<[1], [0], [0], [1], [0, 0, 1, 1], [], []>} : vector<8x128xf32>, vector<128x128xf32>, vector<8x128xf32> -> vector<8x128xf32>
    %51 = vector.extract_strided_slice %21 {offsets = [1, 0], sizes = [1, 128], strides = [1, 1]} : vector<8x128xf32> to vector<1x128xf32>
    %52 = vector.broadcast %51 : vector<1x128xf32> to vector<8x128xf32>
    %53 = arith.addf %50, %52 : vector<8x128xf32>
    %54 = math.tanh %53 : vector<8x128xf32>
    %c264 = arith.constant 264 : index
    %c0_15 = arith.constant 0 : index
    %55 = vector.load %arg3[%c264, %c0_15] : memref<392x128xf32, #tpu.memory_space<vmem>>, vector<128x128xf32>
    %cst_16 = arith.constant dense<0.000000e+00> : vector<8x128xf32>
    %56 = tpu.matmul %54, %55, %cst_16 {dimension_numbers = #tpu.dot_dimension_numbers<[1], [0], [0], [1], [0, 0, 1, 1], [], []>} : vector<8x128xf32>, vector<128x128xf32>, vector<8x128xf32> -> vector<8x128xf32>
    %57 = vector.extract_strided_slice %21 {offsets = [2, 0], sizes = [1, 128], strides = [1, 1]} : vector<8x128xf32> to vector<1x128xf32>
    %58 = vector.broadcast %57 : vector<1x128xf32> to vector<8x128xf32>
    %59 = arith.addf %56, %58 : vector<8x128xf32>
    %c0_17 = arith.constant 0 : index
    %c0_18 = arith.constant 0 : index
    %60 = vector.load %arg4[%c0_17, %c0_18] : memref<8x128xf32, #tpu.memory_space<vmem>>, vector<8x128xf32>
    tpu.vector_store %arg4[%c0_17, %c0_18], %59 {strides = array<i32>} : memref<8x128xf32, #tpu.memory_space<vmem>>, vector<8x128xf32>,
    return
  }
  func.func @transform_0(%arg0: i32) -> (i32, i32) {
    %c0_i32 = arith.constant 0 : i32
    %c0_i32_0 = arith.constant 0 : i32
    return %arg0, %c0_i32 : i32, i32
  }
  func.func @transform_1(%arg0: i32) -> (i32, i32) {
    %c0_i32 = arith.constant 0 : i32
    %c0_i32_0 = arith.constant 0 : i32
    %c0_i32_1 = arith.constant 0 : i32
    return %c0_i32, %c0_i32_0 : i32, i32
  }
  func.func @transform_2(%arg0: i32) -> (i32, i32) {
    %c0_i32 = arith.constant 0 : i32
    %c0_i32_0 = arith.constant 0 : i32
    %c0_i32_1 = arith.constant 0 : i32
    return %c0_i32, %c0_i32_0 : i32, i32
  }
  func.func @transform_3(%arg0: i32) -> (i32, i32) {
    %c0_i32 = arith.constant 0 : i32
    %c0_i32_0 = arith.constant 0 : i32
    return %arg0, %c0_i32 : i32, i32
  }
}

</mosaic_0001>

<bundles_post_ra>
// kernel: cnn_classifier_forward.1
= control target key start
LH: loop header
LB: loop body
LE: loop exit
PB: predicated region body
PF: predicated region fallthrough
CT: control target
= control target key end

     0   :  { %8 = vsyncpa [#allocation3], 0  ;;  %s1370_s0 = inlined_call_operand.vmem [shape: s32[64,1], index: 0, kind: input, shape index: {}]   ;;  %s1371_s1 = inlined_call_operand.hbm [shape: f32[128,384], index: 1, kind: input, shape index: {}]   ;;  %s1372_s2 = inlined_call_operand.hbm [shape: f32[392,128], index: 2, kind: input, shape index: {}]   ;;  %s1373_s3 = inlined_call_operand.vmem [shape: f32[8,128], index: 3, kind: output, shape index: {}]  }
   0x1   :  { %9 = vsyncpa [#allocation5], 0  ;;  %s1183_s12 = smov [#allocation2]  }
   0x2   :  { %s17_s13 = sshll.u32 %s1183_s12, 4  ;;  %s18_s13 = int_to_ptr.vmem [resolvable:$true] %s17_s13 }
   0x3   :  { %s1147_s14 = scalar_lea.vmem %s18_s13, 6144  ;;  %p1152_p1 = scmp.lt.s32.totalorder %s18_s13, %s18_s13 }
   0x4   :  { %p1148_p0 = scmp.ne.s32.totalorder %s18_s13, %s1147_s14  ;;  %p1153_p2 = scmp.lt.s32.totalorder %s1147_s14, %s1147_s14 }
   0x6   :  { %p1154_p3 = por %p1153_p2, %p1152_p1 }
   0x8   :  { %p1155_p4 = pnand %p1154_p3, %p1148_p0 }
   0xa   :  { %1158 = shalt.err (!%p1155_p4)
}
   0xb   :  { %s1184_s15 = smov 384   ;;  %s1185_s16 = smov 24  }
   0xc   :  { %23 = dma.hbm_to_vmem [thread:$0]  %s1371_s1, 6144, %s18_s13, [#allocation3], %s1184_s15, %s1184_s15, %s1185_s16  }
   0xd   :  { %s1186_s19 = smov [#allocation4]  }
   0xe   :  { %s29_s20 = sshll.u32 %s1186_s19, 4  ;;  %s30_s20 = int_to_ptr.vmem [resolvable:$true] %s29_s20 }
   0xf   :  { %s1167_s21 = scalar_lea.vmem %s30_s20, 6272  ;;  %p1172_p6 = scmp.lt.s32.totalorder %s30_s20, %s30_s20 }
  0x10   :  { %p1168_p5 = scmp.ne.s32.totalorder %s30_s20, %s1167_s21  ;;  %p1173_p7 = scmp.lt.s32.totalorder %s1167_s21, %s1167_s21 }
  0x12   :  { %p1174_p8 = por %p1173_p7, %p1172_p6 }
  0x14   :  { %p1175_p9 = pnand %p1174_p8, %p1168_p5 }
  0x16   :  { %1178 = shalt.err (!%p1175_p9)
}
  0x17   :  { %s1187_s22 = smov 128   ;;  %s1188_s23 = smov 8  }
  0x18   :  { %35 = dma.hbm_to_vmem [thread:$0]  %s1372_s2, 6272, %s30_s20, [#allocation5], %s1187_s22, %s1187_s22, %s1188_s23  }
  0x19   :  { %1179 = dma.done.wait [#allocation3], 6144  }
  0x1a   :  { %1180 = vsyncadd [#allocation3], 4294961152 }
  0x1b   :  { %1181 = dma.done.wait [#allocation5], 6272  }
  0x1c   :  { %1182 = vsyncadd [#allocation5], 4294961024  ;;  %v1189_v0 = vmov 0   ;;  %v44_v1 = vld [vmem:[%s1370_s0 + $0x10] sm:$0xff]  ;;  %v42_v2 = vld [vmem:[%s1370_s0] sm:$0xff]  ;;  %v50_v55 = vlaneseq  ;;  %v1190_v59 = vmov 1.0  }
  0x1d   :  { %1136 = vset.pattern.permute.xlu1 %v1189_v0  ;;  %1135 = vset.pattern.permute.xlu0 %v1189_v0  ;;  %v45_v3 = vld [vmem:[%s1370_s0 + $0x18] sm:$0xff]  ;;  %v43_v4 = vld [vmem:[%s1370_s0 + $0x8] sm:$0xff]  ;;  %v114_v6 = vld [vmem:[#allocation4 + $0x70] sm:$0xff]  ;;  %vm1192_vm8 = vmmov 0   ;;  %vm495_vm9 = vcmask 1046528   ;;  %vm536_vm10 = vcmask 1045504  }
  0x1e   :  { %59 = vperm.xlu1 %1136, %v44_v1   ;;  %53 = vperm.xlu0 %1135, %v42_v2   ;;  %v115_v5 = vld [vmem:[#allocation4 + $0x78] sm:$0xff]  ;;  %v113_v7 = vld [vmem:[#allocation4 + $0x68] sm:$0xff]  ;;  %v46_v9 = vld [vmem:[%s1370_s0 + $0x20] sm:$0xff]  ;;  %v1245_v56 = vand.u32 127, %v50_v55 }
  0x1f   :  { %966 = vmatprep.subr.mxu0 %v115_v5  ;;  %v47_v8 = vld [vmem:[%s1370_s0 + $0x28] sm:$0xff]  ;;  %v112_v10 = vld [vmem:[#allocation4 + $0x60] sm:$0xff]  ;;  %v49_v11 = vld [vmem:[%s1370_s0 + $0x38] sm:$0xff] }
  0x20   :  { %967 = vmatpush3.msra.mxu0 %v115_v5  ;;  %v48_v12 = vld [vmem:[%s1370_s0 + $0x30] sm:$0xff]  ;;  %v111_v13 = vld [vmem:[#allocation4 + $0x58] sm:$0xff]  ;;  %v266_v16 = vld [vmem:[#allocation2 + $0x168] sm:$0xff]  ;;  %vm593_vm11 = vcmp.lt.s32.totalorder %v1245_v56, 8  ;;  %vm596_vm12 = vcmp.ge.s32.totalorder %v1245_v56, 8  ;;  %vm597_vm13 = vcmp.lt.s32.totalorder %v1245_v56, 16 }
  0x21   :  { %968 = vmatprep.subr.mxu0 %v114_v6  ;;  %v110_v14 = vld [vmem:[#allocation4 + $0x50] sm:$0xff]  ;;  %v109_v17 = vld [vmem:[#allocation4 + $0x48] sm:$0xff]  ;;  %v264_v18 = vld [vmem:[#allocation2 + $0x158] sm:$0xff] }
  0x22   :  { %62 = vperm.xlu1 %1136, %v45_v3   ;;  %56 = vperm.xlu0 %1135, %v43_v4   ;;  %v267_v15 = vld [vmem:[#allocation2 + $0x170] sm:$0xff]  ;;  %v261_v20 = vld [vmem:[#allocation2 + $0x140] sm:$0xff]  ;;  %v260_v22 = vld [vmem:[#allocation2 + $0x138] sm:$0xff] }
  0x23   :  { %969 = vmatpush3.msra.mxu0 %v114_v6  ;;  %269 = vmatprep.subr.mxu1 %v267_v15  ;;  %v263_v19 = vld [vmem:[#allocation2 + $0x150] sm:$0xff]  ;;  %v108_v21 = vld [vmem:[#allocation4 + $0x40] sm:$0xff]  ;;  %v258_v23 = vld [vmem:[#allocation2 + $0x128] sm:$0xff] }
  0x24   :  { %970 = vmatprep.subr.mxu0 %v113_v7  ;;  %270 = vmatpush1.msra.mxu1 %v266_v16  ;;  %v107_v24 = vld [vmem:[#allocation4 + $0x38] sm:$0xff]  ;;  %v257_v25 = vld [vmem:[#allocation2 + $0x120] sm:$0xff]  ;;  %v255_v26 = vld [vmem:[#allocation2 + $0x110] sm:$0xff] }
  0x25   :  { %971 = vmatpush3.msra.mxu0 %v113_v7  ;;  %271 = vmatprep.subr.mxu1 %v264_v18  ;;  %v106_v27 = vld [vmem:[#allocation4 + $0x30] sm:$0xff]  ;;  %v254_v28 = vld [vmem:[#allocation2 + $0x108] sm:$0xff]  ;;  %v252_v29 = vld [vmem:[#allocation2 + $0xf8] sm:$0xff] }
  0x26   :  { %68 = vperm.xlu1 %1136, %v47_v8   ;;  %65 = vperm.xlu0 %1135, %v46_v9   ;;  %v105_v30 = vld [vmem:[#allocation4 + $0x28] sm:$0xff]  ;;  %v251_v31 = vld [vmem:[#allocation2 + $0xf0] sm:$0xff]  ;;  %v249_v32 = vld [vmem:[#allocation2 + $0xe0] sm:$0xff] }
  0x27   :  { %972 = vmatprep.subr.mxu0 %v112_v10  ;;  %272 = vmatpush1.msra.mxu1 %v263_v19  ;;  %v104_v33 = vld [vmem:[#allocation4 + $0x20] sm:$0xff]  ;;  %v248_v34 = vld [vmem:[#allocation2 + $0xd8] sm:$0xff]  ;;  %v246_v35 = vld [vmem:[#allocation2 + $0xc8] sm:$0xff] }
  0x28   :  { %973 = vmatpush3.msra.mxu0 %v112_v10  ;;  %273 = vmatprep.subr.mxu1 %v261_v20  ;;  %v103_v36 = vld [vmem:[#allocation4 + $0x18] sm:$0xff]  ;;  %v245_v37 = vld [vmem:[#allocation2 + $0xc0] sm:$0xff]  ;;  %v243_v38 = vld [vmem:[#allocation2 + $0xb0] sm:$0xff]  ;;  %v1191_v20 = vmov 0.0  }
  0x29   :  { %974 = vmatprep.subr.mxu0 %v111_v13  ;;  %274 = vmatpush1.msra.mxu1 %v260_v22  ;;  %v102_v39 = vld [vmem:[#allocation4 + $0x10] sm:$0xff]  ;;  %v242_v40 = vld [vmem:[#allocation2 + $0xa8] sm:$0xff]  ;;  %v240_v41 = vld [vmem:[#allocation2 + $0x98] sm:$0xff] }
  0x2a   :  { %74 = vperm.xlu1 %1136, %v49_v11   ;;  %71 = vperm.xlu0 %1135, %v48_v12   ;;  %v101_v42 = vld [vmem:[#allocation4 + $0x8] sm:$0xff]  ;;  %v239_v43 = vld [vmem:[#allocation2 + $0x90] sm:$0xff]  ;;  %v237_v44 = vld [vmem:[#allocation2 + $0x80] sm:$0xff] }
  0x2b   :  { %975 = vmatpush3.msra.mxu0 %v111_v13  ;;  %275 = vmatprep.subr.mxu1 %v258_v23  ;;  %v100_v45 = vld [vmem:[#allocation4] sm:$0xff]  ;;  %v236_v46 = vld [vmem:[#allocation2 + $0x78] sm:$0xff]  ;;  %v234_v47 = vld [vmem:[#allocation2 + $0x68] sm:$0xff] }
  0x2c   :  { %976 = vmatprep.subr.mxu0 %v110_v14  ;;  %276 = vmatpush1.msra.mxu1 %v257_v25  ;;  %v268_v48 = vld [vmem:[#allocation2 + $0x178] sm:$0xff]  ;;  %v233_v49 = vld [vmem:[#allocation2 + $0x60] sm:$0xff]  ;;  %v231_v50 = vld [vmem:[#allocation2 + $0x50] sm:$0xff] }
  0x2d   :  { %977 = vmatpush3.msra.mxu0 %v110_v14  ;;  %277 = vmatprep.subr.mxu1 %v255_v26  ;;  %v230_v51 = vld [vmem:[#allocation2 + $0x48] sm:$0xff]  ;;  %v228_v52 = vld [vmem:[#allocation2 + $0x38] sm:$0xff]  ;;  %v227_v53 = vld [vmem:[#allocation2 + $0x30] sm:$0xff] }
  0x2e   :  { %978 = vmatprep.subr.mxu0 %v109_v17  ;;  %278 = vmatpush1.msra.mxu1 %v254_v28  ;;  %v225_v54 = vld [vmem:[#allocation2 + $0x20] sm:$0xff]  ;;  %v262_v63 = vld [vmem:[#allocation2 + $0x148] sm:$0xff]  ;;  %v259_v2 = vld [vmem:[#allocation2 + $0x130] sm:$0xff] }
  0x2f   :  { %979 = vmatpush3.msra.mxu0 %v109_v17  ;;  %279 = vmatprep.subr.mxu1 %v252_v29  ;;  %v265_v62 = vld [vmem:[#allocation2 + $0x160] sm:$0xff]  ;;  %v256_v3 = vld [vmem:[#allocation2 + $0x118] sm:$0xff]  ;;  %v250_v7 = vld [vmem:[#allocation2 + $0xe8] sm:$0xff] }
  0x30   :  { %980 = vmatprep.subr.mxu0 %v108_v21  ;;  %280 = vmatpush1.msra.mxu1 %v251_v31  ;;  %v253_v5 = vld [vmem:[#allocation2 + $0x100] sm:$0xff]  ;;  %v247_v8 = vld [vmem:[#allocation2 + $0xd0] sm:$0xff]  ;;  %v244_v9 = vld [vmem:[#allocation2 + $0xb8] sm:$0xff] }
  0x31   :  { %981 = vmatpush3.msra.mxu0 %v108_v21  ;;  %281 = vmatprep.subr.mxu1 %v249_v32  ;;  %v241_v10 = vld [vmem:[#allocation2 + $0xa0] sm:$0xff]  ;;  %v238_v11 = vld [vmem:[#allocation2 + $0x88] sm:$0xff]  ;;  %v235_v12 = vld [vmem:[#allocation2 + $0x70] sm:$0xff] }
  0x32   :  { %982 = vmatprep.subr.mxu0 %v107_v24  ;;  %282 = vmatpush1.msra.mxu1 %v248_v34  ;;  %v232_v13 = vld [vmem:[#allocation2 + $0x58] sm:$0xff]  ;;  %v229_v14 = vld [vmem:[#allocation2 + $0x40] sm:$0xff]  ;;  %v226_v16 = vld [vmem:[#allocation2 + $0x28] sm:$0xff] }
  0x33   :  { %983 = vmatpush3.msra.mxu0 %v107_v24  ;;  %283 = vmatprep.subr.mxu1 %v246_v35  ;;  %v224_v15 = vld [vmem:[#allocation2 + $0x18] sm:$0xff]  ;;  %v222_v17 = vld [vmem:[#allocation2 + $0x8] sm:$0xff]  ;;  %v221_v18 = vld [vmem:[#allocation2] sm:$0xff] }
  0x34   :  { %984 = vmatprep.subr.mxu0 %v106_v27  ;;  %284 = vmatpush1.msra.mxu1 %v245_v37  ;;  %v223_v19 = vld [vmem:[#allocation2 + $0x10] sm:$0xff]  ;;  %v672_v29 = vld [vmem:[#allocation4 + $0x100] sm:$0xff]  ;;  %v669_v32 = vld [vmem:[#allocation4 + $0xe8] sm:$0xff] }
  0x35   :  { %985 = vmatpush3.msra.mxu0 %v106_v27  ;;  %285 = vmatprep.subr.mxu1 %v243_v38  ;;  %v670_v31 = vld [vmem:[#allocation4 + $0xf0] sm:$0xff]  ;;  %v667_v34 = vld [vmem:[#allocation4 + $0xd8] sm:$0xff]  ;;  %v664_v37 = vld [vmem:[#allocation4 + $0xc0] sm:$0xff] }
  0x36   :  { %986 = vmatprep.subr.mxu0 %v105_v30  ;;  %286 = vmatpush1.msra.mxu1 %v242_v40  ;;  %v666_v35 = vld [vmem:[#allocation4 + $0xd0] sm:$0xff]  ;;  %v663_v38 = vld [vmem:[#allocation4 + $0xb8] sm:$0xff]  ;;  %v661_v40 = vld [vmem:[#allocation4 + $0xa8] sm:$0xff] }
  0x37   :  { %987 = vmatpush3.msra.mxu0 %v105_v30  ;;  %287 = vmatprep.subr.mxu1 %v240_v41  ;;  %v671_v30 = vld [vmem:[#allocation4 + $0xf8] sm:$0xff]  ;;  %v660_v41 = vld [vmem:[#allocation4 + $0xa0] sm:$0xff]  ;;  %vm1306_vm14 = vmand %vm596_vm12, %vm597_vm13 }
  0x38   :  { %988 = vmatprep.subr.mxu0 %v104_v33  ;;  %288 = vmatpush1.msra.mxu1 %v239_v43  ;;  %v658_v43 = vld [vmem:[#allocation4 + $0x90] sm:$0xff] }
  0x39   :  { %989 = vmatpush3.msra.mxu0 %v104_v33  ;;  %289 = vmatprep.subr.mxu1 %v237_v44  ;;  %v668_v33 = vld [vmem:[#allocation4 + $0xe0] sm:$0xff]  ;;  %v657_v44 = vld [vmem:[#allocation4 + $0x88] sm:$0xff] }
  0x3a   :  { %990 = vmatprep.subr.mxu0 %v103_v36  ;;  %290 = vmatpush1.msra.mxu1 %v236_v46  ;;  %v785_v46 = vld [vmem:[#allocation4 + $0x178] sm:$0xff] }
  0x3b   :  { %991 = vmatpush3.msra.mxu0 %v103_v36  ;;  %291 = vmatprep.subr.mxu1 %v234_v47  ;;  %v665_v36 = vld [vmem:[#allocation4 + $0xc8] sm:$0xff]  ;;  %v784_v47 = vld [vmem:[#allocation4 + $0x170] sm:$0xff] }
  0x3c   :  { %992 = vmatprep.subr.mxu0 %v102_v39  ;;  %292 = vmatpush1.msra.mxu1 %v233_v49  ;;  %v782_v49 = vld [vmem:[#allocation4 + $0x160] sm:$0xff] }
  0x3d   :  { %993 = vmatpush3.msra.mxu0 %v102_v39  ;;  %293 = vmatprep.subr.mxu1 %v231_v50  ;;  %v662_v39 = vld [vmem:[#allocation4 + $0xb0] sm:$0xff]  ;;  %v781_v50 = vld [vmem:[#allocation4 + $0x158] sm:$0xff] }
  0x3e   :  { %994 = vmatprep.subr.mxu0 %v101_v42  ;;  %294 = vmatpush1.msra.mxu1 %v230_v51  ;;  %v780_v51 = vld [vmem:[#allocation4 + $0x150] sm:$0xff] }
  0x3f   :  { %995 = vmatpush3.msra.mxu0 %v101_v42  ;;  %295 = vmatprep.subr.mxu1 %v228_v52  ;;  %v659_v42 = vld [vmem:[#allocation4 + $0x98] sm:$0xff] }
  0x40   :  { %996 = vmatprep.subr.mxu0 %v100_v45  ;;  %296 = vmatpush1.msra.mxu1 %v227_v53 }
  0x41   :  { %997 = vmatpush3.msra.mxu0 %v100_v45  ;;  %297 = vmatprep.subr.mxu1 %v225_v54  ;;  %v786_v45 = vld [vmem:[#allocation4 + $0x180] sm:$0xff] }
  0x42   :  { %1010 = vmatprep.subr.mxu0 %v268_v48  ;;  %298 = vmatpush1.msra.mxu1 %v224_v15 }
  0x43   :  { %299 = vmatprep.subr.mxu1 %v222_v17  ;;  %333 = vmatprep.mubr.f32.mxu1 %v1191_v20 }
  0x44   :  { %300 = vmatpush1.msra.mxu1 %v221_v18  ;;  %v1193_v18 = vmov 4294967295  }
  0x45   :  { %1054 = vmatprep.subr.mxu1 %v1191_v20 }
  0x99   :  { %v60_v57 = vpop.permute.xlu1 %59  ;;  %v54_v58 = vpop.permute.xlu0 %53 }
  0x9a   :  { %vm76_vm0 = vcmp.eq.s32.totalorder %v1245_v56, %v54_v58  ;;  %vm78_vm1 = vcmp.eq.s32.totalorder %v1245_v56, %v60_v57 }
  0x9b   :  { %998 = vmatprep.mubr.msk.f32.mxu0 %vm76_vm0, %v1190_v59  ;;  %vm685_vm0 = vcmask 1041409  }
  0x9d   :  { %v63_v60 = vpop.permute.xlu1 %62  ;;  %v57_v61 = vpop.permute.xlu0 %56 }
  0x9e   :  { %vm77_vm2 = vcmp.eq.s32.totalorder %v1245_v56, %v57_v61  ;;  %vm79_vm3 = vcmp.eq.s32.totalorder %v1245_v56, %v63_v60  ;;  %v1290_v60 = vshrl.u32 %v50_v55, 7 }
  0x9f   :  { %999 = vmatmul.mubr.msk.f32.vlgmr.msra.gmra.mxu0 %vm77_vm2, %v1190_v59  ;;  %vm689_vm2 = vcmask 1043459  }
  0xa0   :  { %1001 = vmatprep.mubr.msk.f32.mxu0 %vm78_vm1, %v1190_v59  ;;  %1011 = vmatpush3.msra.mxu0 %v268_v48  ;;  %v783_v48 = vld [vmem:[#allocation4 + $0x168] sm:$0xff]  ;;  %vm687_vm1 = vcmask 1042434  }
  0xa1   :  { %v69_v0 = vpop.permute.xlu1 %68  ;;  %v66_v1 = vpop.permute.xlu0 %65  ;;  %1012 = vmatprep.subr.mxu0 %v265_v62 }
  0xa2   :  { %vm80_vm4 = vcmp.eq.s32.totalorder %v1245_v56, %v66_v1  ;;  %1013 = vmatpush3.msra.mxu0 %v265_v62  ;;  %vm81_vm5 = vcmp.eq.s32.totalorder %v1245_v56, %v69_v0 }
  0xa3   :  { %1002 = vmatmul.mubr.msk.f32.gmra.mxu0 %vm79_vm3, %v1190_v59  ;;  %1014 = vmatprep.subr.mxu0 %v262_v63  ;;  %vm691_vm3 = vcmask 1044484  }
  0xa4   :  { %1004 = vmatprep.mubr.msk.f32.mxu0 %vm80_vm4, %v1190_v59  ;;  %1015 = vmatpush3.msra.mxu0 %v262_v63  ;;  %vm693_vm4 = vcmask 1045509  }
  0xa5   :  { %v72_v4 = vpop.permute.xlu0 %71  ;;  %1016 = vmatprep.subr.mxu0 %v259_v2  ;;  %v75_v6 = vpop.permute.xlu1 %74 }
  0xa6   :  { %vm82_vm6 = vcmp.eq.s32.totalorder %v1245_v56, %v72_v4  ;;  %1017 = vmatpush3.msra.mxu0 %v259_v2  ;;  %vm83_vm7 = vcmp.eq.s32.totalorder %v1245_v56, %v75_v6  ;;  %v572_v4 = vsub.s32 0, %v1290_v60 }
  0xa7   :  { %1005 = vmatmul.mubr.msk.f32.gmra.mxu0 %vm81_vm5, %v1190_v59  ;;  %1018 = vmatprep.subr.mxu0 %v256_v3  ;;  %vm695_vm5 = vcmask 1046534  }
  0xa8   :  { %1007 = vmatprep.mubr.msk.f32.mxu0 %vm82_vm6, %v1190_v59  ;;  %1019 = vmatpush3.msra.mxu0 %v256_v3  ;;  %vm697_vm6 = vcmask 1047559  }
  0xa9   :  { %1020 = vmatprep.subr.mxu0 %v253_v5 }
  0xaa   :  { %1021 = vmatpush3.msra.mxu0 %v253_v5 }
  0xab   :  { %1008 = vmatmul.mubr.msk.f32.gmra.mxu0 %vm83_vm7, %v1190_v59  ;;  %1022 = vmatprep.subr.mxu0 %v250_v7 }
  0xac   :  { %1023 = vmatpush3.msra.mxu0 %v250_v7  ;;  %v1294_v7 = vld [vmem:[#allocation4 + $0x80] sm:$0xff] }
  0xad   :  { %1024 = vmatprep.subr.mxu0 %v247_v8 }
  0xae   :  { %1025 = vmatpush3.msra.mxu0 %v247_v8 }
  0xaf   :  { %1026 = vmatprep.subr.mxu0 %v244_v9 }
  0xb0   :  { %1027 = vmatpush3.msra.mxu0 %v244_v9 }
  0xb1   :  { %1028 = vmatprep.subr.mxu0 %v241_v10 }
  0xb2   :  { %1029 = vmatpush3.msra.mxu0 %v241_v10 }
  0xb3   :  { %1030 = vmatprep.subr.mxu0 %v238_v11 }
  0xb4   :  { %1031 = vmatpush3.msra.mxu0 %v238_v11 }
  0xb5   :  { %1032 = vmatprep.subr.mxu0 %v235_v12 }
  0xb6   :  { %1033 = vmatpush3.msra.mxu0 %v235_v12 }
  0xb7   :  { %1034 = vmatprep.subr.mxu0 %v232_v13 }
  0xb8   :  { %1035 = vmatpush3.msra.mxu0 %v232_v13 }
  0xb9   :  { %1036 = vmatprep.subr.mxu0 %v229_v14 }
  0xba   :  { %1037 = vmatpush3.msra.mxu0 %v229_v14  ;;  %v1303_v14 = vrot.slane %v1294_v7, %v572_v4 }
  0xbb   :  { %1038 = vmatprep.subr.mxu0 %v226_v16 }
  0xbc   :  { %1039 = vmatpush3.msra.mxu0 %v226_v16 }
  0xbd   :  { %1040 = vmatprep.subr.mxu0 %v223_v19 }
  0xbe   :  { %1041 = vmatpush3.msra.mxu0 %v223_v19  ;;  %v595_v19 = vsel %vm593_vm11, 6, %v1193_v18 }
  0xbf   :  { %1089 = vmatprep.subr.mxu0 %v1191_v20 }
 0x15f   :  { %v1000_v21 = vpop.f32.mrf.mxu0 }
 0x161   :  { %v182_v22 = vpop.f32.mrf.mxu0 }
 0x162   :  { %334 = vmatmul.mubr.f32.vlgmr.msra.gmra.mxu1 %v182_v22  ;;  %1042 = vmatprep.mubr.f32.mxu0 %v182_v22 }
 0x163   :  { %v1003_v23 = vpop.f32.mrf.mxu0  ;;  %1043 = vmatmul.mubr.f32.vlgmr.msra.gmra.mxu0 %v1000_v21  ;;  %339 = vmatprep.mubr.f32.mxu1 %v1191_v20 }
 0x164   :  { %1055 = vmatpush3.msra.mxu1 %v672_v29  ;;  %1090 = vmatpush3.msra.mxu0 %v786_v45  ;;  %v599_v29 = vsel %vm1306_vm14, 5, %v595_v19 }
 0x165   :  { %v192_v24 = vpop.f32.mrf.mxu0  ;;  %1056 = vmatprep.subr.mxu1 %v1191_v20  ;;  %1091 = vmatprep.subr.mxu0 %v1191_v20  ;;  %vm1318_vm15 = vcmp.le.s32.totalorder %v1290_v60, %v599_v29 }
 0x166   :  { %340 = vmatmul.mubr.f32.gmra.mxu1 %v1000_v21  ;;  %1045 = vmatprep.mubr.f32.mxu0 %v192_v24 }
 0x167   :  { %v1006_v25 = vpop.f32.mrf.mxu0  ;;  %1046 = vmatmul.mubr.f32.gmra.mxu0 %v1003_v23  ;;  %345 = vmatprep.mubr.f32.mxu1 %v1191_v20 }
 0x168   :  { %1057 = vmatpush3.msra.mxu1 %v671_v30  ;;  %1092 = vmatpush3.msra.mxu0 %v785_v46 }
 0x169   :  { %v202_v26 = vpop.f32.mrf.mxu0  ;;  %1058 = vmatprep.subr.mxu1 %v1191_v20  ;;  %1093 = vmatprep.subr.mxu0 %v1191_v20 }
 0x16a   :  { %346 = vmatmul.mubr.f32.gmra.mxu1 %v192_v24  ;;  %1048 = vmatprep.mubr.f32.mxu0 %v202_v26 }
 0x16b   :  { %v1009_v27 = vpop.f32.mrf.mxu0  ;;  %1049 = vmatmul.mubr.f32.gmra.mxu0 %v1006_v25  ;;  %351 = vmatprep.mubr.f32.mxu1 %v1191_v20 }
 0x16c   :  { %1059 = vmatpush3.msra.mxu1 %v670_v31  ;;  %1094 = vmatpush3.msra.mxu0 %v784_v47 }
 0x16d   :  { %v212_v28 = vpop.f32.mrf.mxu0  ;;  %1060 = vmatprep.subr.mxu1 %v1191_v20  ;;  %1095 = vmatprep.subr.mxu0 %v1191_v20 }
 0x16e   :  { %352 = vmatmul.mubr.f32.gmra.mxu1 %v1003_v23  ;;  %1051 = vmatprep.mubr.f32.mxu0 %v212_v28 }
 0x16f   :  { %1052 = vmatmul.mubr.f32.gmra.mxu0 %v1009_v27  ;;  %357 = vmatprep.mubr.f32.mxu1 %v1191_v20 }
 0x170   :  { %1061 = vmatpush3.msra.mxu1 %v669_v32  ;;  %1121 = vmatprep.mubr.msk.f32.mxu0 %vm1192_vm8, %v1191_v20 }
 0x171   :  { %1062 = vmatprep.subr.mxu1 %v1191_v20  ;;  %1096 = vmatpush3.msra.mxu0 %v783_v48 }
 0x172   :  { %358 = vmatmul.mubr.f32.gmra.mxu1 %v202_v26  ;;  %1097 = vmatprep.subr.mxu0 %v1191_v20 }
 0x173   :  { %363 = vmatprep.mubr.f32.mxu1 %v1191_v20  ;;  %1063 = vmatpush3.msra.mxu1 %v668_v33 }
 0x174   :  { %1064 = vmatprep.subr.mxu1 %v1191_v20  ;;  %1098 = vmatpush3.msra.mxu0 %v782_v49 }
 0x175   :  { %1065 = vmatpush3.msra.mxu1 %v667_v34  ;;  %1099 = vmatprep.subr.mxu0 %v1191_v20 }
 0x176   :  { %364 = vmatmul.mubr.f32.gmra.mxu1 %v1006_v25  ;;  %1066 = vmatprep.subr.mxu1 %v1191_v20 }
 0x177   :  { %369 = vmatprep.mubr.f32.mxu1 %v1191_v20  ;;  %1067 = vmatpush3.msra.mxu1 %v666_v35 }
 0x178   :  { %1068 = vmatprep.subr.mxu1 %v1191_v20  ;;  %1100 = vmatpush3.msra.mxu0 %v781_v50 }
 0x179   :  { %1069 = vmatpush3.msra.mxu1 %v665_v36  ;;  %1101 = vmatprep.subr.mxu0 %v1191_v20 }
 0x17a   :  { %370 = vmatmul.mubr.f32.gmra.mxu1 %v212_v28  ;;  %1070 = vmatprep.subr.mxu1 %v1191_v20 }
 0x17b   :  { %375 = vmatprep.mubr.f32.mxu1 %v1191_v20  ;;  %1071 = vmatpush3.msra.mxu1 %v664_v37 }
 0x17c   :  { %1072 = vmatprep.subr.mxu1 %v1191_v20  ;;  %1102 = vmatpush3.msra.mxu0 %v780_v51 }
 0x17d   :  { %1073 = vmatpush3.msra.mxu1 %v663_v38  ;;  %1103 = vmatprep.subr.mxu0 %v1191_v20 }
 0x17e   :  { %376 = vmatmul.mubr.f32.gmra.mxu1 %v1009_v27  ;;  %1074 = vmatprep.subr.mxu1 %v1191_v20 }
 0x17f   :  { %1075 = vmatpush3.msra.mxu1 %v662_v39  ;;  %1086 = vmatprep.mubr.msk.f32.mxu1 %vm1192_vm8, %v1191_v20 }
 0x180   :  { %1076 = vmatprep.subr.mxu1 %v1191_v20 }
 0x181   :  { %1077 = vmatpush3.msra.mxu1 %v661_v40 }
 0x182   :  { %1078 = vmatprep.subr.mxu1 %v1191_v20 }
 0x183   :  { %1079 = vmatpush3.msra.mxu1 %v660_v41 }
 0x184   :  { %1080 = vmatprep.subr.mxu1 %v1191_v20 }
 0x185   :  { %1081 = vmatpush3.msra.mxu1 %v659_v42 }
 0x186   :  { %1082 = vmatprep.subr.mxu1 %v1191_v20 }
 0x187   :  { %1083 = vmatpush3.msra.mxu1 %v658_v43 }
 0x188   :  { %1084 = vmatprep.subr.mxu1 %v1191_v20 }
 0x189   :  { %1085 = vmatpush3.msra.mxu1 %v657_v44 }
 0x222   :  { %v335_v52 = vpop.f32.mrf.mxu1 }
 0x223   :  { %v1044_v53 = vpop.f32.mrf.mxu0 }
 0x224   :  { %v337_v54 = vpop.f32.mrf.mxu1  ;;  %v538_v5 = vrot.slane %v1044_v53, 2 }
 0x225   :  { %v448_v57 = vpop.f32.mrf.mxu0  ;;  %v496_v62 = vrot.slane %v337_v54, 1 }
 0x226   :  { %v341_v58 = vpop.f32.mrf.mxu1  ;;  %v537_v0 = vrot.slane %v448_v57, 2 }
 0x227   :  { %v1047_v59 = vpop.f32.mrf.mxu0 }
 0x228   :  { %v343_v61 = vpop.f32.mrf.mxu1  ;;  %v539_v10 = vsel %vm536_vm10, %v537_v0, %v538_v5  ;;  %v542_v26 = vrot.slane %v1047_v59, 2 }
 0x229   :  { %v497_v63 = vrot.slane %v343_v61, 1  ;;  %v458_v1 = vpop.f32.mrf.mxu0 }
 0x22a   :  { %v347_v2 = vpop.f32.mrf.mxu1  ;;  %v540_v55 = vrot.slane %v458_v1, 2 }
 0x22b   :  { %v498_v3 = vsel %vm495_vm9, %v496_v62, %v497_v63  ;;  %v1300_v11 = vpop.f32.mrf.mxu0 }
 0x22c   :  { %v520_v6 = vadd.f32 %v498_v3, %v335_v52  ;;  %v349_v8 = vpop.f32.mrf.mxu1  ;;  %v541_v22 = vsel %vm536_vm10, %v538_v5, %v540_v55  ;;  %v543_v33 = vsel %vm536_vm10, %v540_v55, %v542_v26  ;;  %v546_v54 = vrot.slane %v1300_v11, 2 }
 0x22d   :  { %v499_v9 = vrot.slane %v349_v8, 1  ;;  %v468_v24 = vpop.f32.mrf.mxu0 }
 0x22e   :  { %v353_v12 = vpop.f32.mrf.mxu1  ;;  %v561_v13 = vadd.f32 %v539_v10, %v520_v6  ;;  %v544_v34 = vrot.slane %v468_v24, 2 }
 0x22f   :  { %v500_v15 = vsel %vm495_vm9, %v497_v63, %v499_v9  ;;  %v1053_v37 = vpop.f32.mrf.mxu0 }
 0x230   :  { %v521_v16 = vadd.f32 %v500_v15, %v341_v58  ;;  %v355_v17 = vpop.f32.mrf.mxu1  ;;  %v574_v27 = vadd.f32 %v1303_v14, %v561_v13  ;;  %v545_v47 = vsel %vm536_vm10, %v542_v26, %v544_v34  ;;  %v547_v0 = vsel %vm536_vm10, %v544_v34, %v546_v54 }
 0x231   :  { %v501_v56 = vrot.slane %v355_v17, 1  ;;  %v478_v50 = vpop.f32.mrf.mxu0 }
 0x232   :  { %v562_v23 = vadd.f32 %v541_v22, %v521_v16  ;;  %v359_v25 = vpop.f32.mrf.mxu1  ;;  %v582_v40 = vmax.f32 %v574_v27, 0.0 }
 0x233   :  { %v502_v28 = vsel %vm495_vm9, %v499_v9, %v501_v56  ;;  %v550_v9 = vrot.slane %v1053_v37, 2 }
 0x234   :  { %v575_v30 = vadd.f32 %v1303_v14, %v562_v23  ;;  %v522_v31 = vadd.f32 %v502_v28, %v347_v2  ;;  %v361_v32 = vpop.f32.mrf.mxu1  ;;  %v601_v53 = vsel %vm1318_vm15, %v582_v40, 0.0  ;;  %v548_v2 = vrot.slane %v478_v50, 2 }
 0x235   :  { %v503_v35 = vrot.slane %v361_v32, 1  ;;  %v609_v4 = vrot.slane %v601_v53, 4  ;;  %v560_v24 = vsel %vm536_vm10, %v550_v9, 0.0 }
 0x236   :  { %v583_v36 = vmax.f32 %v575_v30, 0.0  ;;  %v563_v38 = vadd.f32 %v543_v33, %v522_v31  ;;  %v365_v39 = vpop.f32.mrf.mxu1  ;;  %v549_v17 = vsel %vm536_vm10, %v546_v54, %v548_v2  ;;  %v551_v32 = vsel %vm536_vm10, %v548_v2, %v550_v9 }
 0x237   :  { %v504_v42 = vsel %vm495_vm9, %v501_v56, %v503_v35  ;;  %v610_v21 = vmax.f32 %v601_v53, %v609_v4 }
 0x238   :  { %v602_v43 = vsel %vm1318_vm15, %v583_v36, 0.0  ;;  %v576_v44 = vadd.f32 %v1303_v14, %v563_v38  ;;  %v523_v45 = vadd.f32 %v504_v42, %v353_v12  ;;  %v367_v46 = vpop.f32.mrf.mxu1 }
 0x239   :  { %v505_v48 = vrot.slane %v367_v46, 1  ;;  %v615_v57 = vrot.slane %v602_v43, 4 }
 0x23a   :  { %v584_v49 = vmax.f32 %v576_v44, 0.0  ;;  %v564_v51 = vadd.f32 %v545_v47, %v523_v45  ;;  %v371_v52 = vpop.f32.mrf.mxu1 }
 0x23b   :  { %v506_v58 = vsel %vm495_vm9, %v503_v35, %v505_v48  ;;  %v616_v55 = vmax.f32 %v602_v43, %v615_v57  ;;  %v611_v35 = vrot.slane %v610_v21, 2 }
 0x23c   :  { %v603_v59 = vsel %vm1318_vm15, %v584_v49, 0.0  ;;  %v577_v61 = vadd.f32 %v1303_v14, %v564_v51  ;;  %v524_v62 = vadd.f32 %v506_v58, %v359_v25  ;;  %v373_v63 = vpop.f32.mrf.mxu1 }
 0x23d   :  { %v621_v1 = vrot.slane %v603_v59, 4  ;;  %v507_v3 = vrot.slane %v373_v63, 1  ;;  %v617_v23 = vrot.slane %v616_v55, 2  ;;  %v612_v49 = vmax.f32 %v610_v21, %v611_v35  ;;  %v772_v35 = vld [vmem:[#allocation4 + $0x110] sm:$0xff] }
 0x23e   :  { %v585_v5 = vmax.f32 %v577_v61, 0.0  ;;  %v565_v6 = vadd.f32 %v547_v0, %v524_v62  ;;  %v377_v8 = vpop.f32.mrf.mxu1 }
 0x23f   :  { %v508_v10 = vsel %vm495_vm9, %v505_v48, %v507_v3  ;;  %v622_v16 = vmax.f32 %v603_v59, %v621_v1  ;;  %v618_v42 = vmax.f32 %v616_v55, %v617_v23  ;;  %v613_v0 = vrot.slane %v612_v49, 1 }
 0x240   :  { %v604_v11 = vsel %vm1318_vm15, %v585_v5, 0.0  ;;  %v578_v12 = vadd.f32 %v1303_v14, %v565_v6  ;;  %v525_v13 = vadd.f32 %v508_v10, %v365_v39  ;;  %v379_v15 = vpop.f32.mrf.mxu1 }
 0x241   :  { %v627_v18 = vrot.slane %v604_v11, 4  ;;  %v509_v19 = vrot.slane %v379_v15, 1  ;;  %v623_v31 = vrot.slane %v622_v16, 2  ;;  %v619_v57 = vrot.slane %v618_v42, 1 }
 0x242   :  { %v586_v22 = vmax.f32 %v578_v12, 0.0  ;;  %v566_v56 = vadd.f32 %v549_v17, %v525_v13  ;;  %v614_v10 = vmax.f32 %v612_v49, %v613_v0 }
 0x243   :  { %v628_v25 = vmax.f32 %v604_v11, %v627_v18  ;;  %v510_v26 = vsel %vm495_vm9, %v507_v3, %v509_v19  ;;  %v519_v29 = vsel %vm495_vm9, %v509_v19, 0.0  ;;  %v624_v45 = vmax.f32 %v622_v16, %v623_v31  ;;  %v776_v31 = vld [vmem:[#allocation4 + $0x130] sm:$0xff] }
 0x244   :  { %v605_v27 = vsel %vm1318_vm15, %v586_v22, 0.0  ;;  %v579_v28 = vadd.f32 %v1303_v14, %v566_v56  ;;  %v526_v30 = vadd.f32 %v510_v26, %v371_v52  ;;  %v527_v34 = vadd.f32 %v519_v29, %v377_v8  ;;  %v778_v29 = vld [vmem:[#allocation4 + $0x140] sm:$0xff] }
 0x245   :  { %v633_v33 = vrot.slane %v605_v27, 4  ;;  %v629_v36 = vrot.slane %v628_v25, 2  ;;  %v625_v59 = vrot.slane %v624_v45, 1  ;;  %v620_v5 = vmax.f32 %v618_v42, %v619_v57 }
 0x246   :  { %v587_v37 = vmax.f32 %v579_v28, 0.0  ;;  %v567_v38 = vadd.f32 %v551_v32, %v526_v30  ;;  %v568_v40 = vadd.f32 %v560_v24, %v527_v34  ;;  %v779_v28 = vld [vmem:[#allocation4 + $0x148] sm:$0xff]  ;;  %v777_v30 = vld [vmem:[#allocation4 + $0x138] sm:$0xff] }
 0x247   :  { %v634_v39 = vmax.f32 %v605_v27, %v633_v33  ;;  %v630_v50 = vmax.f32 %v628_v25, %v629_v36  ;;  %v626_v8 = vmax.f32 %v624_v45, %v625_v59  ;;  %v686_v17 = vsel %vm685_vm0, %v620_v5, %v614_v10  ;;  %1104 = vmatpush3.msra.mxu0 %v779_v28  ;;  %v775_v32 = vld [vmem:[#allocation4 + $0x128] sm:$0xff]  ;;  %v774_v33 = vld [vmem:[#allocation4 + $0x120] sm:$0xff]  ;;  %v773_v34 = vld [vmem:[#allocation4 + $0x118] sm:$0xff] }
 0x248   :  { %v606_v43 = vsel %vm1318_vm15, %v587_v37, 0.0  ;;  %v580_v44 = vadd.f32 %v1303_v14, %v567_v38  ;;  %v581_v48 = vadd.f32 %v1303_v14, %v568_v40  ;;  %1105 = vmatprep.subr.mxu0 %v1191_v20  ;;  %v771_v36 = vld [vmem:[#allocation4 + $0x108] sm:$0xff]  ;;  %v675_v37 = vsub.s32 1, %v1290_v60 }
 0x249   :  { %v635_v46 = vrot.slane %v634_v39, 2  ;;  %v639_v47 = vrot.slane %v606_v43, 4  ;;  %v631_v1 = vrot.slane %v630_v50, 1  ;;  %v688_v19 = vsel %vm687_vm1, %v626_v8, %v686_v17  ;;  %1106 = vmatpush3.msra.mxu0 %v778_v29 }
 0x24a   :  { %v588_v51 = vmax.f32 %v580_v44, 0.0  ;;  %v589_v54 = vmax.f32 %v581_v48, 0.0  ;;  %1107 = vmatprep.subr.mxu0 %v1191_v20  ;;  %v676_v38 = vrot.slane %v1294_v7, %v675_v37  ;;  %v789_v44 = vsub.s32 2, %v1290_v60 }
 0x24b   :  { %v636_v52 = vmax.f32 %v634_v39, %v635_v46  ;;  %v640_v53 = vmax.f32 %v606_v43, %v639_v47  ;;  %v632_v11 = vmax.f32 %v630_v50, %v631_v1  ;;  %1108 = vmatpush3.msra.mxu0 %v777_v30 }
 0x24c   :  { %v607_v58 = vsel %vm1318_vm15, %v588_v51, 0.0  ;;  %v608_v62 = vsel %vm1318_vm15, %v589_v54, 0.0  ;;  %1109 = vmatprep.subr.mxu0 %v1191_v20  ;;  %v790_v45 = vrot.slane %v1294_v7, %v789_v44 }
 0x24d   :  { %v641_v61 = vrot.slane %v640_v53, 2  ;;  %v645_v63 = vrot.slane %v607_v58, 4  ;;  %v651_v2 = vrot.slane %v608_v62, 4  ;;  %v637_v14 = vrot.slane %v636_v52, 1  ;;  %1110 = vmatpush3.msra.mxu0 %v776_v31 }
 0x24e   :  { %v690_v22 = vsel %vm689_vm2, %v632_v11, %v688_v19  ;;  %1111 = vmatprep.subr.mxu0 %v1191_v20 }
 0x24f   :  { %v642_v3 = vmax.f32 %v640_v53, %v641_v61  ;;  %v646_v4 = vmax.f32 %v607_v58, %v645_v63  ;;  %v652_v6 = vmax.f32 %v608_v62, %v651_v2  ;;  %v638_v13 = vmax.f32 %v636_v52, %v637_v14  ;;  %1112 = vmatpush3.msra.mxu0 %v775_v32 }
 0x250   :  { %1113 = vmatprep.subr.mxu0 %v1191_v20 }
 0x251   :  { %v647_v55 = vrot.slane %v646_v4, 2  ;;  %v643_v9 = vrot.slane %v642_v3, 1  ;;  %v653_v12 = vrot.slane %v652_v6, 2  ;;  %v692_v23 = vsel %vm691_vm3, %v638_v13, %v690_v22  ;;  %1114 = vmatpush3.msra.mxu0 %v774_v33 }
 0x252   :  { %1115 = vmatprep.subr.mxu0 %v1191_v20 }
 0x253   :  { %v648_v41 = vmax.f32 %v646_v4, %v647_v55  ;;  %v644_v15 = vmax.f32 %v642_v3, %v643_v9  ;;  %v654_v16 = vmax.f32 %v652_v6, %v653_v12  ;;  %1116 = vmatpush3.msra.mxu0 %v773_v34 }
 0x254   :  { %1117 = vmatprep.subr.mxu0 %v1191_v20 }
 0x255   :  { %v649_v18 = vrot.slane %v648_v41, 1  ;;  %v655_v21 = vrot.slane %v654_v16, 1  ;;  %v694_v25 = vsel %vm693_vm4, %v644_v15, %v692_v23  ;;  %1118 = vmatpush3.msra.mxu0 %v772_v35 }
 0x256   :  { %1119 = vmatprep.subr.mxu0 %v1191_v20 }
 0x257   :  { %v650_v56 = vmax.f32 %v648_v41, %v649_v18  ;;  %v656_v24 = vmax.f32 %v654_v16, %v655_v21  ;;  %1120 = vmatpush3.msra.mxu0 %v771_v36 }
 0x259   :  { %v696_v26 = vsel %vm695_vm5, %v650_v56, %v694_v25 }
 0x25a   :  { %v698_v27 = vsel %vm697_vm6, %v656_v24, %v696_v26 }
 0x25b   :  { %1087 = vmatmul.mubr.f32.vlgmr.msra.gmra.mxu1 %v698_v27 }
 0x31b   :  { %v766_v39 = vpop.f32.mrf.mxu1 }
 0x31c   :  { %v767_v40 = vadd.f32 %v766_v39, %v676_v38 }
 0x31d   :  { %v1088_v42 = vpop.f32.mrf.mxu1 }
 0x31e   :  { %1137 = vtanh.f32 %v767_v40 }
 0x32b   :  { %v1138_v43 = vpop.eup %1137 }
 0x32c   :  { %1122 = vmatmul.mubr.f32.vlgmr.msra.gmra.mxu0 %v1138_v43 }
 0x3ec   :  { %v857_v46 = vpop.f32.mrf.mxu0 }
 0x3ed   :  { %v858_v47 = vadd.f32 %v857_v46, %v790_v45 }
 0x3ee   :  { %v1123_v48 = vpop.f32.mrf.mxu0 }
 0x3ef   :  { %861 = vst [vmem:[%s1373_s3] sm:$0xff] %v858_v47 }
 0x3f0   :  { %866 = vsyncpa [#allocation3], 1 }
 0x3f1   :  { %867 = vsyncpa [#allocation5], 1 }

</bundles_post_ra>
